<compile_context>
chip_gen: v7x
topology: tpu7x:2x2x1
jax: 0.10.0
libtpu: 0.0.40
codegen_flags: <defaults>
</compile_context>

<pallas_src>
import jax
import jax.numpy as jnp
from jax import lax
from jax.experimental import pallas as pl
from jax.experimental.pallas import tpu as pltpu

WEIGHTS = (3000.0, 100.0, 50.0, 100.0)   # same defaults as the PyTorch module
A_2D = 2.0                               # "a" for dims == 2

_NUM_PLANES = 10   # mp, nmp, gx, gy, mh00, mh01, mh11, nh00, nh01, nh11
_NUM_TERMS = 4     # dirichlet, inter, neumann, ma


def _round_up(x, m):
    return ((x + m - 1) // m) * m


def _device_defaults():
    """(block_rows, num_parallel) tuned per TPU generation."""
    kind = ""
    try:
        kind = jax.devices()[0].device_kind.lower()
    except Exception:
        pass
    if "v7" in kind:
        return 256, 2     # 2 TensorCores / chip, 64 MiB VMEM -> moderate tiles
    if "v6" in kind:
        return 512, 1     # 1 TC, 128 MiB VMEM -> big tiles
    if "v5" in kind:
        return 256, 1     # 1 TC, lowest HBM BW -> modest tiles
    return 256, 1


# ----------------------------------------------------------------------------
# Pallas kernel: tiled streaming reduction over all four loss terms.
# ----------------------------------------------------------------------------
def _make_loss_kernel(total, block_rows, lanes, tiles_per_chunk):
    block_elems = block_rows * lanes

    def kernel(mp_ref, nmp_ref, gx_ref, gy_ref,
               mh00_ref, mh01_ref, mh11_ref,
               nh00_ref, nh01_ref, nh11_ref,
               out_ref, acc_ref):
        c = pl.program_id(0)
        t = pl.program_id(1)

        @pl.when(t == 0)
        def _():
            acc_ref[...] = jnp.zeros_like(acc_ref)

        step = c * tiles_per_chunk + t          # logical (unclamped) tile index
        block_start = step * block_elems        # flat element offset of tile

        def accumulate(mask):
            def add(i, contrib):
                if mask is not None:
                    contrib = jnp.where(mask, contrib, 0.0)
                # Fold the sublane-split axis only (no lane crossing): keeps
                # the accumulator at (4, 8, lanes) regardless of tile size.
                folded = contrib.reshape(block_rows // 8, 8, lanes).sum(axis=0)
                acc_ref[i] = acc_ref[i] + folded

            # Each plane is loaded immediately before use (short live ranges).
            mp = mp_ref[...].astype(jnp.float32)
            add(0, jnp.abs(mp))                               # dirichlet
            nmp = nmp_ref[...].astype(jnp.float32)
            add(1, jnp.exp(-100.0 * jnp.abs(nmp)))            # inter (dims==2)
            gx = gx_ref[...].astype(jnp.float32)
            gy = gy_ref[...].astype(jnp.float32)
            add(2, jnp.sqrt(gx * gx + gy * gy))               # neumann
            mh00 = mh00_ref[...].astype(jnp.float32)
            mh01 = mh01_ref[...].astype(jnp.float32)
            mh11 = mh11_ref[...].astype(jnp.float32)
            det_m = (mh00 - A_2D) * (mh11 - A_2D) - mh01 * mh01
            nh00 = nh00_ref[...].astype(jnp.float32)
            nh01 = nh01_ref[...].astype(jnp.float32)
            nh11 = nh11_ref[...].astype(jnp.float32)
            det_n = (nh00 - A_2D) * (nh11 - A_2D) - nh01 * nh01
            add(3, jnp.abs(det_m) + jnp.abs(det_n))           # ma

        is_full = block_start + block_elems <= total

        # Fast path: fully-valid tile, no mask.
        @pl.when(is_full)
        def _():
            accumulate(None)

        # Ragged tail (or phantom parallel-chunk step): mask by flat index.
        @pl.when(jnp.logical_not(is_full))
        def _():
            flat = (block_start
                    + lax.broadcasted_iota(jnp.int32, (block_rows, lanes), 0)
                    * lanes
                    + lax.broadcasted_iota(jnp.int32, (block_rows, lanes), 1))
            accumulate(flat < total)

        @pl.when(t == tiles_per_chunk - 1)
        def _():
            # One cross-lane reduce per term; broadcast each scalar across a
            # lane-dense 128-wide row for an unmasked store.
            rows = [jnp.broadcast_to(jnp.sum(acc_ref[i]), (1, 128))
                    for i in range(_NUM_TERMS)]
            out_ref[0] = jnp.concatenate(rows, axis=0)

    return kernel


# ----------------------------------------------------------------------------
# Wrapper.
# ----------------------------------------------------------------------------
def pallas_loss(manifold_pred, nonmnfld_pred, mnfld_grad, mnfld_hess, near_hess,
                weights=WEIGHTS, *, lanes=512, block_rows=None,
                num_parallel=None, plane_dtype=jnp.bfloat16):
    """Loss forward (dims == 2 branch).

    manifold_pred : (B, N)   nonmnfld_pred : (B, N)
    mnfld_grad    : (B, N, 2)
    mnfld_hess    : (B, N, 2, 2)   near_hess : (B, N, 2, 2)
    """
    B, N = manifold_pred.shape
    assert nonmnfld_pred.shape == (B, N)
    assert mnfld_grad.shape == (B, N, 2)
    assert mnfld_hess.shape == (B, N, 2, 2)
    assert near_hess.shape == (B, N, 2, 2)

    total = B * N
    inv_count = 1.0 / float(total)

    def_rows, def_par = _device_defaults()
    if block_rows is None:
        block_rows = def_rows
    if num_parallel is None:
        num_parallel = def_par

    rows = _round_up(pl.cdiv(total, lanes), 8)          # whole (8, lanes) rows
    block_rows = max(8, min(_round_up(block_rows, 8), rows))
    num_tiles = pl.cdiv(rows, block_rows)
    C = max(1, min(num_parallel, num_tiles))            # parallel chunks
    T = pl.cdiv(num_tiles, C)                           # tiles per chunk

    # Planar (struct-of-arrays) extraction: slice + tiny pad + reshape + cast.
    # Fuses with the upstream autodiff producers under jit.
    # TODO(synk): have the derivative computation emit this planar layout
    #             (and bf16) directly so even this single fused pass disappears.
    pad = rows * lanes - total

    def plane(a):
        flat = a.reshape(-1)
        if pad:
            flat = jnp.pad(flat, (0, pad))               # masked in-kernel
        return flat.astype(plane_dtype).reshape(rows, lanes)

    planes = [
        plane(manifold_pred),
        plane(nonmnfld_pred),
        plane(mnfld_grad[..., 0]),
        plane(mnfld_grad[..., 1]),
        plane(mnfld_hess[..., 0, 0]),
        plane(mnfld_hess[..., 0, 1]),
        plane(mnfld_hess[..., 1, 1]),
        plane(near_hess[..., 0, 0]),
        plane(near_hess[..., 0, 1]),
        plane(near_hess[..., 1, 1]),
    ]

    def make_in_spec():
        # Clamp the block index so phantom steps (when C*T > num_tiles) re-read
        # the last real tile (DMA is skipped for repeated indices) and are
        # zeroed by the in-kernel mask.
        return pl.BlockSpec(
            (block_rows, lanes),
            lambda c, t, T=T, last=num_tiles - 1: (jnp.minimum(c * T + t, last),
                                                   0))

    # Double-buffered inputs dominate VMEM; raise the scoped limit when needed
    # (matters for f32 planes with big tiles, especially on v5e's 16 MiB
    # scoped default).
    itemsize = jnp.dtype(plane_dtype).itemsize
    vmem_needed = (2 * _NUM_PLANES * block_rows * lanes * itemsize
                   + _NUM_TERMS * 8 * lanes * 4
                   + 2 * _NUM_TERMS * 128 * 4)
    cp_kwargs = dict(dimension_semantics=("parallel", "arbitrary"))
    if vmem_needed > 12 * 1024 * 1024:
        cp_kwargs["vmem_limit_bytes"] = int(min(vmem_needed + (16 << 20),
                                                96 << 20))

    kernel = _make_loss_kernel(total, block_rows, lanes, T)

    partials = pl.pallas_call(
        kernel,
        out_shape=jax.ShapeDtypeStruct((C, _NUM_TERMS, 128), jnp.float32),
        grid_spec=pltpu.PrefetchScalarGridSpec(
            num_scalar_prefetch=0,
            grid=(C, T),
            in_specs=[make_in_spec() for _ in range(_NUM_PLANES)],
            out_specs=pl.BlockSpec((1, _NUM_TERMS, 128),
                                   lambda c, t: (c, 0, 0)),
            scratch_shapes=[pltpu.VMEM((_NUM_TERMS, 8, lanes), jnp.float32)]),
        compiler_params=pltpu.CompilerParams(**cp_kwargs),
    )(*planes)

    # Tiny final combine over the C parallel chunks.
    sums = jnp.sum(partials[:, :, 0], axis=0)            # (4,)
    dirichlet = sums[0] * inv_count
    inter = sums[1] * inv_count
    neumann = sums[2] * inv_count
    ma = sums[3] * inv_count
    w = [float(x) for x in weights]
    loss = w[0] * dirichlet + w[1] * inter + w[2] * neumann + w[3] * ma
    return {"loss": loss, "dirichlet_term": dirichlet, "inter_term": inter,
            "neumann_term": neumann, "ma_term": ma}


# ----------------------------------------------------------------------------
# Glue: synthetic SDF network + autodiff (plays the role of utils.gradient).
# TODO(synk): utils.gradient (PyTorch autograd through the external network)
#             has no in-kernel equivalent; it is done here with jax.grad/hessian.
# ----------------------------------------------------------------------------
def make_sdf(key, hidden=32):
    k1, k2, k3 = jax.random.split(key, 3)
    w1 = jax.random.normal(k1, (2, hidden), jnp.float32) * 0.5
    b1 = jax.random.normal(k2, (hidden,), jnp.float32) * 0.1
    w2 = jax.random.normal(k3, (hidden, 1), jnp.float32) * 0.5

    def sdf(p):  # p: (2,) -> scalar
        h = jnp.tanh(p @ w1 + b1)
        return (h @ w2)[0]

    return sdf


def pred_grad_hess(sdf, points):
    B, N, D = points.shape
    flat = points.reshape(-1, D)
    pred = jax.vmap(sdf)(flat).reshape(B, N)
    grad = jax.vmap(jax.grad(sdf))(flat).reshape(B, N, D)
    hess = jax.vmap(jax.hessian(sdf))(flat).reshape(B, N, D, D)
    return pred, grad, hess


# Pure-JAX reference of the PyTorch forward (dims == 2 branch).
def reference_loss(manifold_pred, nonmnfld_pred, mnfld_grad, mnfld_hess,
                   near_hess, weights=WEIGHTS):
    eye = A_2D * jnp.eye(2, dtype=jnp.float32)
    dirichlet = jnp.mean(jnp.abs(manifold_pred))
    inter = jnp.mean(jnp.exp(-100.0 * jnp.abs(nonmnfld_pred)))
    neumann = jnp.mean(jnp.linalg.norm(mnfld_grad, axis=-1))
    mdet = jnp.mean(jnp.abs(jnp.linalg.det(mnfld_hess - eye)))
    ndet = jnp.mean(jnp.abs(jnp.linalg.det(near_hess - eye)))
    ma = mdet + ndet
    loss = (weights[0] * dirichlet + weights[1] * inter
            + weights[2] * neumann + weights[3] * ma)
    return {"loss": loss, "dirichlet_term": dirichlet, "inter_term": inter,
            "neumann_term": neumann, "ma_term": ma}


# Reference on dtype-quantized planes (isolates bf16 input quantization).
def reference_loss_quantized(manifold_pred, nonmnfld_pred, mnfld_grad,
                             mnfld_hess, near_hess, dtype, weights=WEIGHTS):
    q = lambda x: x.astype(dtype).astype(jnp.float32)
    mp, nmp = q(manifold_pred), q(nonmnfld_pred)
    gx, gy = q(mnfld_grad[..., 0]), q(mnfld_grad[..., 1])
    mh00, mh01, mh11 = (q(mnfld_hess[..., 0, 0]), q(mnfld_hess[..., 0, 1]),
                        q(mnfld_hess[..., 1, 1]))
    nh00, nh01, nh11 = (q(near_hess[..., 0, 0]), q(near_hess[..., 0, 1]),
                        q(near_hess[..., 1, 1]))
    dirichlet = jnp.mean(jnp.abs(mp))
    inter = jnp.mean(jnp.exp(-100.0 * jnp.abs(nmp)))
    neumann = jnp.mean(jnp.sqrt(gx * gx + gy * gy))
    mdet = jnp.mean(jnp.abs((mh00 - A_2D) * (mh11 - A_2D) - mh01 * mh01))
    ndet = jnp.mean(jnp.abs((nh00 - A_2D) * (nh11 - A_2D) - nh01 * nh01))
    ma = mdet + ndet
    loss = (weights[0] * dirichlet + weights[1] * inter
            + weights[2] * neumann + weights[3] * ma)
    return {"loss": loss, "dirichlet_term": dirichlet, "inter_term": inter,
            "neumann_term": neumann, "ma_term": ma}


if __name__ == "__main__":
    B, N, D = 2, 2000, 2   # dims == 2 branch; B*N not tile-aligned -> masking

    key = jax.random.PRNGKey(0)
    k_net, k_m, k_nm, k_near = jax.random.split(key, 4)

    sdf = make_sdf(k_net, hidden=32)

    mnfld_points = jax.random.normal(k_m, (B, N, D), jnp.float32)
    nonmnfld_points = jax.random.uniform(k_nm, (B, N, D), dtype=jnp.float32,
                                         minval=-1.0, maxval=1.0)
    near_points = mnfld_points + 0.1 * jax.random.normal(
        k_near, (B, N, D), jnp.float32)

    manifold_pred, mnfld_grad, mnfld_hess = pred_grad_hess(sdf, mnfld_points)
    nonmnfld_pred, _, _ = pred_grad_hess(sdf, nonmnfld_points)
    _, _, near_hess = pred_grad_hess(sdf, near_points)
    # near_points_pred only feeds derivatives in the PyTorch loss; the
    # nonmanifold Hessian det is computed there but unused, so it is skipped.

    ref = reference_loss(manifold_pred, nonmnfld_pred, mnfld_grad,
                         mnfld_hess, near_hess)
    ref_bf16 = reference_loss_quantized(manifold_pred, nonmnfld_pred,
                                        mnfld_grad, mnfld_hess, near_hess,
                                        jnp.bfloat16)

    checks = [
        # Small tiles + 2 chunks: exercises multi-tile grid, phantom-step
        # clamping and the in-kernel ragged-tail mask.  f32 planes vs exact ref.
        (dict(plane_dtype=jnp.float32, lanes=128, block_rows=8, num_parallel=2),
         ref, 1e-4),
        # Production-default tiling with f32 planes vs exact reference.
        (dict(plane_dtype=jnp.float32), ref, 1e-4),
        # Default bf16 planes vs reference on bf16-quantized planes.
        (dict(), ref_bf16, 1e-4),
    ]
    for cfg, expected, tol in checks:
        fn = jax.jit(lambda a, b, c, d, e, _cfg=cfg: pallas_loss(a, b, c, d, e,
                                                                 **_cfg))
        out = fn(manifold_pred, nonmnfld_pred, mnfld_grad, mnfld_hess,
                 near_hess)
        out = {k: jax.block_until_ready(v) for k, v in out.items()}
        for k in expected:
            assert jnp.allclose(out[k], expected[k], rtol=tol, atol=tol), (
                cfg, k, out[k], expected[k])

    print("KERNEL_OK")
</pallas_src>

<mosaic_0001>
module attributes {stable_mosaic.version = 11 : i64} {
  func.func @kernel(%arg0: i32, %arg1: i32, %arg2: memref<8x128xf32, #tpu.memory_space<vmem>>, %arg3: memref<8x128xf32, #tpu.memory_space<vmem>>, %arg4: memref<8x128xf32, #tpu.memory_space<vmem>>, %arg5: memref<8x128xf32, #tpu.memory_space<vmem>>, %arg6: memref<8x128xf32, #tpu.memory_space<vmem>>, %arg7: memref<8x128xf32, #tpu.memory_space<vmem>>, %arg8: memref<8x128xf32, #tpu.memory_space<vmem>>, %arg9: memref<8x128xf32, #tpu.memory_space<vmem>>, %arg10: memref<8x128xf32, #tpu.memory_space<vmem>>, %arg11: memref<8x128xf32, #tpu.memory_space<vmem>>, %arg12: memref<1x4x128xf32, #tpu.memory_space<vmem>>, %arg13: memref<4x8x128xf32, #tpu.memory_space<vmem>>) attributes {dimension_semantics = [#tpu.dimension_semantics<parallel>, #tpu.dimension_semantics<arbitrary>], iteration_bounds = array<i64: 2, 2>, scalar_prefetch = 0 : i64, scratch_operands = 1 : i64, tpu.core_type = #tpu.core_type<tc>, window_params = [{transform_indices = @transform_0, window_bounds = array<i64: 8, 128>}, {transform_indices = @transform_1, window_bounds = array<i64: 8, 128>}, {transform_indices = @transform_2, window_bounds = array<i64: 8, 128>}, {transform_indices = @transform_3, window_bounds = array<i64: 8, 128>}, {transform_indices = @transform_4, window_bounds = array<i64: 8, 128>}, {transform_indices = @transform_5, window_bounds = array<i64: 8, 128>}, {transform_indices = @transform_6, window_bounds = array<i64: 8, 128>}, {transform_indices = @transform_7, window_bounds = array<i64: 8, 128>}, {transform_indices = @transform_8, window_bounds = array<i64: 8, 128>}, {transform_indices = @transform_9, window_bounds = array<i64: 8, 128>}, {transform_indices = @transform_10, window_bounds = array<i64: 1, 4, 128>}]} {
    %c0_i32 = arith.constant 0 : i32
    %0 = arith.cmpi eq, %arg1, %c0_i32 : i32
    %1 = arith.extui %0 : i1 to i32
    %c0_i32_0 = arith.constant 0 : i32
    %2 = arith.cmpi ne, %1, %c0_i32_0 : i32
    scf.if %2 {
      %cst = arith.constant 0.000000e+00 : f32
      %16 = vector.broadcast %cst : f32 to vector<4x8x128xf32>
      %c0 = arith.constant 0 : index
      %c0_5 = arith.constant 0 : index
      %c0_6 = arith.constant 0 : index
      %17 = vector.load %arg13[%c0, %c0_5, %c0_6] : memref<4x8x128xf32, #tpu.memory_space<vmem>>, vector<4x8x128xf32>
      tpu.vector_store %arg13[%c0, %c0_5, %c0_6], %16 {strides = array<i32>} : memref<4x8x128xf32, #tpu.memory_space<vmem>>, vector<4x8x128xf32>,
    } else {
    }
    %c2_i32 = arith.constant 2 : i32
    %3 = arith.muli %arg0, %c2_i32 : i32
    %4 = arith.addi %3, %arg1 : i32
    %c1024_i32 = arith.constant 1024 : i32
    %5 = arith.muli %4, %c1024_i32 : i32
    %c1024_i32_1 = arith.constant 1024 : i32
    %6 = arith.addi %5, %c1024_i32_1 : i32
    %c4000_i32 = arith.constant 4000 : i32
    %7 = arith.cmpi sle, %6, %c4000_i32 : i32
    %8 = arith.extui %7 : i1 to i32
    %c0_i32_2 = arith.constant 0 : i32
    %9 = arith.cmpi ne, %8, %c0_i32_2 : i32
    scf.if %9 {
      %c0 = arith.constant 0 : index
      %c0_5 = arith.constant 0 : index
      %16 = vector.load %arg2[%c0, %c0_5] : memref<8x128xf32, #tpu.memory_space<vmem>>, vector<8x128xf32>
      %17 = math.absf %16 : vector<8x128xf32>
      %18 = vector.shape_cast %17 : vector<8x128xf32> to vector<1x8x128xf32>
      %cst = arith.constant dense<0.000000e+00> : vector<8x128xf32>
      %19 = vector.multi_reduction <add>, %18, %cst [0] : vector<1x8x128xf32> to vector<8x128xf32>
      %c0_6 = arith.constant 0 : index
      %c0_7 = arith.constant 0 : index
      %c0_8 = arith.constant 0 : index
      %20 = vector.load %arg13[%c0_6, %c0_7, %c0_8] : memref<4x8x128xf32, #tpu.memory_space<vmem>>, vector<1x8x128xf32>
      %21 = vector.shape_cast %20 : vector<1x8x128xf32> to vector<8x128xf32>
      %22 = arith.addf %21, %19 : vector<8x128xf32>
      %c0_9 = arith.constant 0 : index
      %c0_10 = arith.constant 0 : index
      %c0_11 = arith.constant 0 : index
      %23 = vector.load %arg13[%c0_9, %c0_10, %c0_11] : memref<4x8x128xf32, #tpu.memory_space<vmem>>, vector<1x8x128xf32>
      %24 = vector.shape_cast %23 : vector<1x8x128xf32> to vector<8x128xf32>
      %25 = vector.shape_cast %22 : vector<8x128xf32> to vector<1x8x128xf32>
      tpu.vector_store %arg13[%c0_9, %c0_10, %c0_11], %25 {strides = array<i32>} : memref<4x8x128xf32, #tpu.memory_space<vmem>>, vector<1x8x128xf32>,
      %c0_12 = arith.constant 0 : index
      %c0_13 = arith.constant 0 : index
      %26 = vector.load %arg3[%c0_12, %c0_13] : memref<8x128xf32, #tpu.memory_space<vmem>>, vector<8x128xf32>
      %27 = math.absf %26 : vector<8x128xf32>
      %cst_14 = arith.constant -1.000000e+02 : f32
      %28 = vector.broadcast %cst_14 : f32 to vector<8x128xf32>
      %29 = arith.mulf %28, %27 : vector<8x128xf32>
      %30 = math.exp %29 : vector<8x128xf32>
      %31 = vector.shape_cast %30 : vector<8x128xf32> to vector<1x8x128xf32>
      %cst_15 = arith.constant dense<0.000000e+00> : vector<8x128xf32>
      %32 = vector.multi_reduction <add>, %31, %cst_15 [0] : vector<1x8x128xf32> to vector<8x128xf32>
      %c1 = arith.constant 1 : index
      %c0_16 = arith.constant 0 : index
      %c0_17 = arith.constant 0 : index
      %33 = vector.load %arg13[%c1, %c0_16, %c0_17] : memref<4x8x128xf32, #tpu.memory_space<vmem>>, vector<1x8x128xf32>
      %34 = vector.shape_cast %33 : vector<1x8x128xf32> to vector<8x128xf32>
      %35 = arith.addf %34, %32 : vector<8x128xf32>
      %c1_18 = arith.constant 1 : index
      %c0_19 = arith.constant 0 : index
      %c0_20 = arith.constant 0 : index
      %36 = vector.load %arg13[%c1_18, %c0_19, %c0_20] : memref<4x8x128xf32, #tpu.memory_space<vmem>>, vector<1x8x128xf32>
      %37 = vector.shape_cast %36 : vector<1x8x128xf32> to vector<8x128xf32>
      %38 = vector.shape_cast %35 : vector<8x128xf32> to vector<1x8x128xf32>
      tpu.vector_store %arg13[%c1_18, %c0_19, %c0_20], %38 {strides = array<i32>} : memref<4x8x128xf32, #tpu.memory_space<vmem>>, vector<1x8x128xf32>,
      %c0_21 = arith.constant 0 : index
      %c0_22 = arith.constant 0 : index
      %39 = vector.load %arg4[%c0_21, %c0_22] : memref<8x128xf32, #tpu.memory_space<vmem>>, vector<8x128xf32>
      %c0_23 = arith.constant 0 : index
      %c0_24 = arith.constant 0 : index
      %40 = vector.load %arg5[%c0_23, %c0_24] : memref<8x128xf32, #tpu.memory_space<vmem>>, vector<8x128xf32>
      %41 = arith.mulf %39, %39 : vector<8x128xf32>
      %42 = arith.mulf %40, %40 : vector<8x128xf32>
      %43 = arith.addf %41, %42 : vector<8x128xf32>
      %44 = math.sqrt %43 : vector<8x128xf32>
      %45 = vector.shape_cast %44 : vector<8x128xf32> to vector<1x8x128xf32>
      %cst_25 = arith.constant dense<0.000000e+00> : vector<8x128xf32>
      %46 = vector.multi_reduction <add>, %45, %cst_25 [0] : vector<1x8x128xf32> to vector<8x128xf32>
      %c2 = arith.constant 2 : index
      %c0_26 = arith.constant 0 : index
      %c0_27 = arith.constant 0 : index
      %47 = vector.load %arg13[%c2, %c0_26, %c0_27] : memref<4x8x128xf32, #tpu.memory_space<vmem>>, vector<1x8x128xf32>
      %48 = vector.shape_cast %47 : vector<1x8x128xf32> to vector<8x128xf32>
      %49 = arith.addf %48, %46 : vector<8x128xf32>
      %c2_28 = arith.constant 2 : index
      %c0_29 = arith.constant 0 : index
      %c0_30 = arith.constant 0 : index
      %50 = vector.load %arg13[%c2_28, %c0_29, %c0_30] : memref<4x8x128xf32, #tpu.memory_space<vmem>>, vector<1x8x128xf32>
      %51 = vector.shape_cast %50 : vector<1x8x128xf32> to vector<8x128xf32>
      %52 = vector.shape_cast %49 : vector<8x128xf32> to vector<1x8x128xf32>
      tpu.vector_store %arg13[%c2_28, %c0_29, %c0_30], %52 {strides = array<i32>} : memref<4x8x128xf32, #tpu.memory_space<vmem>>, vector<1x8x128xf32>,
      %c0_31 = arith.constant 0 : index
      %c0_32 = arith.constant 0 : index
      %53 = vector.load %arg6[%c0_31, %c0_32] : memref<8x128xf32, #tpu.memory_space<vmem>>, vector<8x128xf32>
      %c0_33 = arith.constant 0 : index
      %c0_34 = arith.constant 0 : index
      %54 = vector.load %arg7[%c0_33, %c0_34] : memref<8x128xf32, #tpu.memory_space<vmem>>, vector<8x128xf32>
      %c0_35 = arith.constant 0 : index
      %c0_36 = arith.constant 0 : index
      %55 = vector.load %arg8[%c0_35, %c0_36] : memref<8x128xf32, #tpu.memory_space<vmem>>, vector<8x128xf32>
      %cst_37 = arith.constant 2.000000e+00 : f32
      %56 = vector.broadcast %cst_37 : f32 to vector<8x128xf32>
      %57 = arith.subf %53, %56 : vector<8x128xf32>
      %cst_38 = arith.constant 2.000000e+00 : f32
      %58 = vector.broadcast %cst_38 : f32 to vector<8x128xf32>
      %59 = arith.subf %55, %58 : vector<8x128xf32>
      %60 = arith.mulf %57, %59 : vector<8x128xf32>
      %61 = arith.mulf %54, %54 : vector<8x128xf32>
      %62 = arith.subf %60, %61 : vector<8x128xf32>
      %c0_39 = arith.constant 0 : index
      %c0_40 = arith.constant 0 : index
      %63 = vector.load %arg9[%c0_39, %c0_40] : memref<8x128xf32, #tpu.memory_space<vmem>>, vector<8x128xf32>
      %c0_41 = arith.constant 0 : index
      %c0_42 = arith.constant 0 : index
      %64 = vector.load %arg10[%c0_41, %c0_42] : memref<8x128xf32, #tpu.memory_space<vmem>>, vector<8x128xf32>
      %c0_43 = arith.constant 0 : index
      %c0_44 = arith.constant 0 : index
      %65 = vector.load %arg11[%c0_43, %c0_44] : memref<8x128xf32, #tpu.memory_space<vmem>>, vector<8x128xf32>
      %cst_45 = arith.constant 2.000000e+00 : f32
      %66 = vector.broadcast %cst_45 : f32 to vector<8x128xf32>
      %67 = arith.subf %63, %66 : vector<8x128xf32>
      %cst_46 = arith.constant 2.000000e+00 : f32
      %68 = vector.broadcast %cst_46 : f32 to vector<8x128xf32>
      %69 = arith.subf %65, %68 : vector<8x128xf32>
      %70 = arith.mulf %67, %69 : vector<8x128xf32>
      %71 = arith.mulf %64, %64 : vector<8x128xf32>
      %72 = arith.subf %70, %71 : vector<8x128xf32>
      %73 = math.absf %62 : vector<8x128xf32>
      %74 = math.absf %72 : vector<8x128xf32>
      %75 = arith.addf %73, %74 : vector<8x128xf32>
      %76 = vector.shape_cast %75 : vector<8x128xf32> to vector<1x8x128xf32>
      %cst_47 = arith.constant dense<0.000000e+00> : vector<8x128xf32>
      %77 = vector.multi_reduction <add>, %76, %cst_47 [0] : vector<1x8x128xf32> to vector<8x128xf32>
      %c3 = arith.constant 3 : index
      %c0_48 = arith.constant 0 : index
      %c0_49 = arith.constant 0 : index
      %78 = vector.load %arg13[%c3, %c0_48, %c0_49] : memref<4x8x128xf32, #tpu.memory_space<vmem>>, vector<1x8x128xf32>
      %79 = vector.shape_cast %78 : vector<1x8x128xf32> to vector<8x128xf32>
      %80 = arith.addf %79, %77 : vector<8x128xf32>
      %c3_50 = arith.constant 3 : index
      %c0_51 = arith.constant 0 : index
      %c0_52 = arith.constant 0 : index
      %81 = vector.load %arg13[%c3_50, %c0_51, %c0_52] : memref<4x8x128xf32, #tpu.memory_space<vmem>>, vector<1x8x128xf32>
      %82 = vector.shape_cast %81 : vector<1x8x128xf32> to vector<8x128xf32>
      %83 = vector.shape_cast %80 : vector<8x128xf32> to vector<1x8x128xf32>
      tpu.vector_store %arg13[%c3_50, %c0_51, %c0_52], %83 {strides = array<i32>} : memref<4x8x128xf32, #tpu.memory_space<vmem>>, vector<1x8x128xf32>,
    } else {
    }
    %true = arith.constant true
    %10 = arith.xori %7, %true : i1
    %11 = arith.extui %10 : i1 to i32
    %c0_i32_3 = arith.constant 0 : i32
    %12 = arith.cmpi ne, %11, %c0_i32_3 : i32
    scf.if %12 {
      %16 = tpu.iota {dimensions = array<i32: 0>} : vector<8x128xi32>
      %c128_i32 = arith.constant 128 : i32
      %17 = vector.broadcast %c128_i32 : i32 to vector<8x128xi32>
      %18 = arith.muli %16, %17 : vector<8x128xi32>
      %19 = vector.broadcast %5 : i32 to vector<8x128xi32>
      %20 = arith.addi %19, %18 : vector<8x128xi32>
      %21 = tpu.iota {dimensions = array<i32: 1>} : vector<8x128xi32>
      %22 = arith.addi %20, %21 : vector<8x128xi32>
      %c4000_i32_5 = arith.constant 4000 : i32
      %23 = vector.broadcast %c4000_i32_5 : i32 to vector<8x128xi32>
      %24 = arith.cmpi slt, %22, %23 : vector<8x128xi32>
      %c0 = arith.constant 0 : index
      %c0_6 = arith.constant 0 : index
      %25 = vector.load %arg2[%c0, %c0_6] : memref<8x128xf32, #tpu.memory_space<vmem>>, vector<8x128xf32>
      %26 = math.absf %25 : vector<8x128xf32>
      %cst = arith.constant 0.000000e+00 : f32
      %27 = vector.broadcast %cst : f32 to vector<8x128xf32>
      %28 = arith.select %24, %26, %27 : vector<8x128xi1>, vector<8x128xf32>
      %29 = vector.shape_cast %28 : vector<8x128xf32> to vector<1x8x128xf32>
      %cst_7 = arith.constant dense<0.000000e+00> : vector<8x128xf32>
      %30 = vector.multi_reduction <add>, %29, %cst_7 [0] : vector<1x8x128xf32> to vector<8x128xf32>
      %c0_8 = arith.constant 0 : index
      %c0_9 = arith.constant 0 : index
      %c0_10 = arith.constant 0 : index
      %31 = vector.load %arg13[%c0_8, %c0_9, %c0_10] : memref<4x8x128xf32, #tpu.memory_space<vmem>>, vector<1x8x128xf32>
      %32 = vector.shape_cast %31 : vector<1x8x128xf32> to vector<8x128xf32>
      %33 = arith.addf %32, %30 : vector<8x128xf32>
      %c0_11 = arith.constant 0 : index
      %c0_12 = arith.constant 0 : index
      %c0_13 = arith.constant 0 : index
      %34 = vector.load %arg13[%c0_11, %c0_12, %c0_13] : memref<4x8x128xf32, #tpu.memory_space<vmem>>, vector<1x8x128xf32>
      %35 = vector.shape_cast %34 : vector<1x8x128xf32> to vector<8x128xf32>
      %36 = vector.shape_cast %33 : vector<8x128xf32> to vector<1x8x128xf32>
      tpu.vector_store %arg13[%c0_11, %c0_12, %c0_13], %36 {strides = array<i32>} : memref<4x8x128xf32, #tpu.memory_space<vmem>>, vector<1x8x128xf32>,
      %c0_14 = arith.constant 0 : index
      %c0_15 = arith.constant 0 : index
      %37 = vector.load %arg3[%c0_14, %c0_15] : memref<8x128xf32, #tpu.memory_space<vmem>>, vector<8x128xf32>
      %38 = math.absf %37 : vector<8x128xf32>
      %cst_16 = arith.constant -1.000000e+02 : f32
      %39 = vector.broadcast %cst_16 : f32 to vector<8x128xf32>
      %40 = arith.mulf %39, %38 : vector<8x128xf32>
      %41 = math.exp %40 : vector<8x128xf32>
      %cst_17 = arith.constant 0.000000e+00 : f32
      %42 = vector.broadcast %cst_17 : f32 to vector<8x128xf32>
      %43 = arith.select %24, %41, %42 : vector<8x128xi1>, vector<8x128xf32>
      %44 = vector.shape_cast %43 : vector<8x128xf32> to vector<1x8x128xf32>
      %cst_18 = arith.constant dense<0.000000e+00> : vector<8x128xf32>
      %45 = vector.multi_reduction <add>, %44, %cst_18 [0] : vector<1x8x128xf32> to vector<8x128xf32>
      %c1 = arith.constant 1 : index
      %c0_19 = arith.constant 0 : index
      %c0_20 = arith.constant 0 : index
      %46 = vector.load %arg13[%c1, %c0_19, %c0_20] : memref<4x8x128xf32, #tpu.memory_space<vmem>>, vector<1x8x128xf32>
      %47 = vector.shape_cast %46 : vector<1x8x128xf32> to vector<8x128xf32>
      %48 = arith.addf %47, %45 : vector<8x128xf32>
      %c1_21 = arith.constant 1 : index
      %c0_22 = arith.constant 0 : index
      %c0_23 = arith.constant 0 : index
      %49 = vector.load %arg13[%c1_21, %c0_22, %c0_23] : memref<4x8x128xf32, #tpu.memory_space<vmem>>, vector<1x8x128xf32>
      %50 = vector.shape_cast %49 : vector<1x8x128xf32> to vector<8x128xf32>
      %51 = vector.shape_cast %48 : vector<8x128xf32> to vector<1x8x128xf32>
      tpu.vector_store %arg13[%c1_21, %c0_22, %c0_23], %51 {strides = array<i32>} : memref<4x8x128xf32, #tpu.memory_space<vmem>>, vector<1x8x128xf32>,
      %c0_24 = arith.constant 0 : index
      %c0_25 = arith.constant 0 : index
      %52 = vector.load %arg4[%c0_24, %c0_25] : memref<8x128xf32, #tpu.memory_space<vmem>>, vector<8x128xf32>
      %c0_26 = arith.constant 0 : index
      %c0_27 = arith.constant 0 : index
      %53 = vector.load %arg5[%c0_26, %c0_27] : memref<8x128xf32, #tpu.memory_space<vmem>>, vector<8x128xf32>
      %54 = arith.mulf %52, %52 : vector<8x128xf32>
      %55 = arith.mulf %53, %53 : vector<8x128xf32>
      %56 = arith.addf %54, %55 : vector<8x128xf32>
      %57 = math.sqrt %56 : vector<8x128xf32>
      %cst_28 = arith.constant 0.000000e+00 : f32
      %58 = vector.broadcast %cst_28 : f32 to vector<8x128xf32>
      %59 = arith.select %24, %57, %58 : vector<8x128xi1>, vector<8x128xf32>
      %60 = vector.shape_cast %59 : vector<8x128xf32> to vector<1x8x128xf32>
      %cst_29 = arith.constant dense<0.000000e+00> : vector<8x128xf32>
      %61 = vector.multi_reduction <add>, %60, %cst_29 [0] : vector<1x8x128xf32> to vector<8x128xf32>
      %c2 = arith.constant 2 : index
      %c0_30 = arith.constant 0 : index
      %c0_31 = arith.constant 0 : index
      %62 = vector.load %arg13[%c2, %c0_30, %c0_31] : memref<4x8x128xf32, #tpu.memory_space<vmem>>, vector<1x8x128xf32>
      %63 = vector.shape_cast %62 : vector<1x8x128xf32> to vector<8x128xf32>
      %64 = arith.addf %63, %61 : vector<8x128xf32>
      %c2_32 = arith.constant 2 : index
      %c0_33 = arith.constant 0 : index
      %c0_34 = arith.constant 0 : index
      %65 = vector.load %arg13[%c2_32, %c0_33, %c0_34] : memref<4x8x128xf32, #tpu.memory_space<vmem>>, vector<1x8x128xf32>
      %66 = vector.shape_cast %65 : vector<1x8x128xf32> to vector<8x128xf32>
      %67 = vector.shape_cast %64 : vector<8x128xf32> to vector<1x8x128xf32>
      tpu.vector_store %arg13[%c2_32, %c0_33, %c0_34], %67 {strides = array<i32>} : memref<4x8x128xf32, #tpu.memory_space<vmem>>, vector<1x8x128xf32>,
      %c0_35 = arith.constant 0 : index
      %c0_36 = arith.constant 0 : index
      %68 = vector.load %arg6[%c0_35, %c0_36] : memref<8x128xf32, #tpu.memory_space<vmem>>, vector<8x128xf32>
      %c0_37 = arith.constant 0 : index
      %c0_38 = arith.constant 0 : index
      %69 = vector.load %arg7[%c0_37, %c0_38] : memref<8x128xf32, #tpu.memory_space<vmem>>, vector<8x128xf32>
      %c0_39 = arith.constant 0 : index
      %c0_40 = arith.constant 0 : index
      %70 = vector.load %arg8[%c0_39, %c0_40] : memref<8x128xf32, #tpu.memory_space<vmem>>, vector<8x128xf32>
      %cst_41 = arith.constant 2.000000e+00 : f32
      %71 = vector.broadcast %cst_41 : f32 to vector<8x128xf32>
      %72 = arith.subf %68, %71 : vector<8x128xf32>
      %cst_42 = arith.constant 2.000000e+00 : f32
      %73 = vector.broadcast %cst_42 : f32 to vector<8x128xf32>
      %74 = arith.subf %70, %73 : vector<8x128xf32>
      %75 = arith.mulf %72, %74 : vector<8x128xf32>
      %76 = arith.mulf %69, %69 : vector<8x128xf32>
      %77 = arith.subf %75, %76 : vector<8x128xf32>
      %c0_43 = arith.constant 0 : index
      %c0_44 = arith.constant 0 : index
      %78 = vector.load %arg9[%c0_43, %c0_44] : memref<8x128xf32, #tpu.memory_space<vmem>>, vector<8x128xf32>
      %c0_45 = arith.constant 0 : index
      %c0_46 = arith.constant 0 : index
      %79 = vector.load %arg10[%c0_45, %c0_46] : memref<8x128xf32, #tpu.memory_space<vmem>>, vector<8x128xf32>
      %c0_47 = arith.constant 0 : index
      %c0_48 = arith.constant 0 : index
      %80 = vector.load %arg11[%c0_47, %c0_48] : memref<8x128xf32, #tpu.memory_space<vmem>>, vector<8x128xf32>
      %cst_49 = arith.constant 2.000000e+00 : f32
      %81 = vector.broadcast %cst_49 : f32 to vector<8x128xf32>
      %82 = arith.subf %78, %81 : vector<8x128xf32>
      %cst_50 = arith.constant 2.000000e+00 : f32
      %83 = vector.broadcast %cst_50 : f32 to vector<8x128xf32>
      %84 = arith.subf %80, %83 : vector<8x128xf32>
      %85 = arith.mulf %82, %84 : vector<8x128xf32>
      %86 = arith.mulf %79, %79 : vector<8x128xf32>
      %87 = arith.subf %85, %86 : vector<8x128xf32>
      %88 = math.absf %77 : vector<8x128xf32>
      %89 = math.absf %87 : vector<8x128xf32>
      %90 = arith.addf %88, %89 : vector<8x128xf32>
      %cst_51 = arith.constant 0.000000e+00 : f32
      %91 = vector.broadcast %cst_51 : f32 to vector<8x128xf32>
      %92 = arith.select %24, %90, %91 : vector<8x128xi1>, vector<8x128xf32>
      %93 = vector.shape_cast %92 : vector<8x128xf32> to vector<1x8x128xf32>
      %cst_52 = arith.constant dense<0.000000e+00> : vector<8x128xf32>
      %94 = vector.multi_reduction <add>, %93, %cst_52 [0] : vector<1x8x128xf32> to vector<8x128xf32>
      %c3 = arith.constant 3 : index
      %c0_53 = arith.constant 0 : index
      %c0_54 = arith.constant 0 : index
      %95 = vector.load %arg13[%c3, %c0_53, %c0_54] : memref<4x8x128xf32, #tpu.memory_space<vmem>>, vector<1x8x128xf32>
      %96 = vector.shape_cast %95 : vector<1x8x128xf32> to vector<8x128xf32>
      %97 = arith.addf %96, %94 : vector<8x128xf32>
      %c3_55 = arith.constant 3 : index
      %c0_56 = arith.constant 0 : index
      %c0_57 = arith.constant 0 : index
      %98 = vector.load %arg13[%c3_55, %c0_56, %c0_57] : memref<4x8x128xf32, #tpu.memory_space<vmem>>, vector<1x8x128xf32>
      %99 = vector.shape_cast %98 : vector<1x8x128xf32> to vector<8x128xf32>
      %100 = vector.shape_cast %97 : vector<8x128xf32> to vector<1x8x128xf32>
      tpu.vector_store %arg13[%c3_55, %c0_56, %c0_57], %100 {strides = array<i32>} : memref<4x8x128xf32, #tpu.memory_space<vmem>>, vector<1x8x128xf32>,
    } else {
    }
    %c1_i32 = arith.constant 1 : i32
    %13 = arith.cmpi eq, %arg1, %c1_i32 : i32
    %14 = arith.extui %13 : i1 to i32
    %c0_i32_4 = arith.constant 0 : i32
    %15 = arith.cmpi ne, %14, %c0_i32_4 : i32
    scf.if %15 {
      %c0 = arith.constant 0 : index
      %c0_5 = arith.constant 0 : index
      %c0_6 = arith.constant 0 : index
      %16 = vector.load %arg13[%c0, %c0_5, %c0_6] : memref<4x8x128xf32, #tpu.memory_space<vmem>>, vector<1x8x128xf32>
      %17 = vector.shape_cast %16 : vector<1x8x128xf32> to vector<8x128xf32>
      %18 = vector.shape_cast %17 : vector<8x128xf32> to vector<1x8x128xf32>
      %cst = arith.constant dense<0.000000e+00> : vector<1xf32>
      %19 = vector.multi_reduction <add>, %18, %cst [1, 2] : vector<1x8x128xf32> to vector<1xf32>
      %20 = vector.shape_cast %19 : vector<1xf32> to vector<1x1x1xf32>
      %21 = vector.extract %20[0, 0, 0] : f32 from vector<1x1x1xf32>
      %22 = vector.broadcast %21 : f32 to vector<1x128xf32>
      %c1 = arith.constant 1 : index
      %c0_7 = arith.constant 0 : index
      %c0_8 = arith.constant 0 : index
      %23 = vector.load %arg13[%c1, %c0_7, %c0_8] : memref<4x8x128xf32, #tpu.memory_space<vmem>>, vector<1x8x128xf32>
      %24 = vector.shape_cast %23 : vector<1x8x128xf32> to vector<8x128xf32>
      %25 = vector.shape_cast %24 : vector<8x128xf32> to vector<1x8x128xf32>
      %cst_9 = arith.constant dense<0.000000e+00> : vector<1xf32>
      %26 = vector.multi_reduction <add>, %25, %cst_9 [1, 2] : vector<1x8x128xf32> to vector<1xf32>
      %27 = vector.shape_cast %26 : vector<1xf32> to vector<1x1x1xf32>
      %28 = vector.extract %27[0, 0, 0] : f32 from vector<1x1x1xf32>
      %29 = vector.broadcast %28 : f32 to vector<1x128xf32>
      %c2 = arith.constant 2 : index
      %c0_10 = arith.constant 0 : index
      %c0_11 = arith.constant 0 : index
      %30 = vector.load %arg13[%c2, %c0_10, %c0_11] : memref<4x8x128xf32, #tpu.memory_space<vmem>>, vector<1x8x128xf32>
      %31 = vector.shape_cast %30 : vector<1x8x128xf32> to vector<8x128xf32>
      %32 = vector.shape_cast %31 : vector<8x128xf32> to vector<1x8x128xf32>
      %cst_12 = arith.constant dense<0.000000e+00> : vector<1xf32>
      %33 = vector.multi_reduction <add>, %32, %cst_12 [1, 2] : vector<1x8x128xf32> to vector<1xf32>
      %34 = vector.shape_cast %33 : vector<1xf32> to vector<1x1x1xf32>
      %35 = vector.extract %34[0, 0, 0] : f32 from vector<1x1x1xf32>
      %36 = vector.broadcast %35 : f32 to vector<1x128xf32>
      %c3 = arith.constant 3 : index
      %c0_13 = arith.constant 0 : index
      %c0_14 = arith.constant 0 : index
      %37 = vector.load %arg13[%c3, %c0_13, %c0_14] : memref<4x8x128xf32, #tpu.memory_space<vmem>>, vector<1x8x128xf32>
      %38 = vector.shape_cast %37 : vector<1x8x128xf32> to vector<8x128xf32>
      %39 = vector.shape_cast %38 : vector<8x128xf32> to vector<1x8x128xf32>
      %cst_15 = arith.constant dense<0.000000e+00> : vector<1xf32>
      %40 = vector.multi_reduction <add>, %39, %cst_15 [1, 2] : vector<1x8x128xf32> to vector<1xf32>
      %41 = vector.shape_cast %40 : vector<1xf32> to vector<1x1x1xf32>
      %42 = vector.extract %41[0, 0, 0] : f32 from vector<1x1x1xf32>
      %43 = vector.broadcast %42 : f32 to vector<1x128xf32>
      %44 = tpu.concatenate %22, %29, %36, %43 in 0 : vector<1x128xf32>, vector<1x128xf32>, vector<1x128xf32>, vector<1x128xf32> -> vector<4x128xf32>
      %c0_16 = arith.constant 0 : index
      %c0_17 = arith.constant 0 : index
      %c0_18 = arith.constant 0 : index
      %45 = vector.load %arg12[%c0_16, %c0_17, %c0_18] : memref<1x4x128xf32, #tpu.memory_space<vmem>>, vector<1x4x128xf32>
      %46 = vector.shape_cast %45 : vector<1x4x128xf32> to vector<4x128xf32>
      %47 = vector.shape_cast %44 : vector<4x128xf32> to vector<1x4x128xf32>
      tpu.vector_store %arg12[%c0_16, %c0_17, %c0_18], %47 {strides = array<i32>} : memref<1x4x128xf32, #tpu.memory_space<vmem>>, vector<1x4x128xf32>,
    } else {
    }
    return
  }
  func.func @transform_0(%arg0: i32, %arg1: i32) -> (i32, i32) {
    %c2_i32 = arith.constant 2 : i32
    %0 = arith.muli %arg0, %c2_i32 : i32
    %1 = arith.addi %0, %arg1 : i32
    %c3_i32 = arith.constant 3 : i32
    %2 = arith.minsi %1, %c3_i32 : i32
    %c0_i32 = arith.constant 0 : i32
    %c0_i32_0 = arith.constant 0 : i32
    return %2, %c0_i32 : i32, i32
  }
  func.func @transform_1(%arg0: i32, %arg1: i32) -> (i32, i32) {
    %c2_i32 = arith.constant 2 : i32
    %0 = arith.muli %arg0, %c2_i32 : i32
    %1 = arith.addi %0, %arg1 : i32
    %c3_i32 = arith.constant 3 : i32
    %2 = arith.minsi %1, %c3_i32 : i32
    %c0_i32 = arith.constant 0 : i32
    %c0_i32_0 = arith.constant 0 : i32
    return %2, %c0_i32 : i32, i32
  }
  func.func @transform_2(%arg0: i32, %arg1: i32) -> (i32, i32) {
    %c2_i32 = arith.constant 2 : i32
    %0 = arith.muli %arg0, %c2_i32 : i32
    %1 = arith.addi %0, %arg1 : i32
    %c3_i32 = arith.constant 3 : i32
    %2 = arith.minsi %1, %c3_i32 : i32
    %c0_i32 = arith.constant 0 : i32
    %c0_i32_0 = arith.constant 0 : i32
    return %2, %c0_i32 : i32, i32
  }
  func.func @transform_3(%arg0: i32, %arg1: i32) -> (i32, i32) {
    %c2_i32 = arith.constant 2 : i32
    %0 = arith.muli %arg0, %c2_i32 : i32
    %1 = arith.addi %0, %arg1 : i32
    %c3_i32 = arith.constant 3 : i32
    %2 = arith.minsi %1, %c3_i32 : i32
    %c0_i32 = arith.constant 0 : i32
    %c0_i32_0 = arith.constant 0 : i32
    return %2, %c0_i32 : i32, i32
  }
  func.func @transform_4(%arg0: i32, %arg1: i32) -> (i32, i32) {
    %c2_i32 = arith.constant 2 : i32
    %0 = arith.muli %arg0, %c2_i32 : i32
    %1 = arith.addi %0, %arg1 : i32
    %c3_i32 = arith.constant 3 : i32
    %2 = arith.minsi %1, %c3_i32 : i32
    %c0_i32 = arith.constant 0 : i32
    %c0_i32_0 = arith.constant 0 : i32
    return %2, %c0_i32 : i32, i32
  }
  func.func @transform_5(%arg0: i32, %arg1: i32) -> (i32, i32) {
    %c2_i32 = arith.constant 2 : i32
    %0 = arith.muli %arg0, %c2_i32 : i32
    %1 = arith.addi %0, %arg1 : i32
    %c3_i32 = arith.constant 3 : i32
    %2 = arith.minsi %1, %c3_i32 : i32
    %c0_i32 = arith.constant 0 : i32
    %c0_i32_0 = arith.constant 0 : i32
    return %2, %c0_i32 : i32, i32
  }
  func.func @transform_6(%arg0: i32, %arg1: i32) -> (i32, i32) {
    %c2_i32 = arith.constant 2 : i32
    %0 = arith.muli %arg0, %c2_i32 : i32
    %1 = arith.addi %0, %arg1 : i32
    %c3_i32 = arith.constant 3 : i32
    %2 = arith.minsi %1, %c3_i32 : i32
    %c0_i32 = arith.constant 0 : i32
    %c0_i32_0 = arith.constant 0 : i32
    return %2, %c0_i32 : i32, i32
  }
  func.func @transform_7(%arg0: i32, %arg1: i32) -> (i32, i32) {
    %c2_i32 = arith.constant 2 : i32
    %0 = arith.muli %arg0, %c2_i32 : i32
    %1 = arith.addi %0, %arg1 : i32
    %c3_i32 = arith.constant 3 : i32
    %2 = arith.minsi %1, %c3_i32 : i32
    %c0_i32 = arith.constant 0 : i32
    %c0_i32_0 = arith.constant 0 : i32
    return %2, %c0_i32 : i32, i32
  }
  func.func @transform_8(%arg0: i32, %arg1: i32) -> (i32, i32) {
    %c2_i32 = arith.constant 2 : i32
    %0 = arith.muli %arg0, %c2_i32 : i32
    %1 = arith.addi %0, %arg1 : i32
    %c3_i32 = arith.constant 3 : i32
    %2 = arith.minsi %1, %c3_i32 : i32
    %c0_i32 = arith.constant 0 : i32
    %c0_i32_0 = arith.constant 0 : i32
    return %2, %c0_i32 : i32, i32
  }
  func.func @transform_9(%arg0: i32, %arg1: i32) -> (i32, i32) {
    %c2_i32 = arith.constant 2 : i32
    %0 = arith.muli %arg0, %c2_i32 : i32
    %1 = arith.addi %0, %arg1 : i32
    %c3_i32 = arith.constant 3 : i32
    %2 = arith.minsi %1, %c3_i32 : i32
    %c0_i32 = arith.constant 0 : i32
    %c0_i32_0 = arith.constant 0 : i32
    return %2, %c0_i32 : i32, i32
  }
  func.func @transform_10(%arg0: i32, %arg1: i32) -> (i32, i32, i32) {
    %c0_i32 = arith.constant 0 : i32
    %c0_i32_0 = arith.constant 0 : i32
    %c0_i32_1 = arith.constant 0 : i32
    return %arg0, %c0_i32, %c0_i32_0 : i32, i32, i32
  }
}

</mosaic_0001>

<bundles_post_ra>
// kernel: _lambda_.1
= control target key start
LH: loop header
LB: loop body
LE: loop exit
PB: predicated region body
PF: predicated region fallthrough
CT: control target
= control target key end

     0   :  { %s1422_s13 = smov 0   ;;  %s1424_s14 = smov 0   ;;  %s1565_s0 = inlined_call_operand.vmem [shape: f32[32,128], index: 0, kind: input, shape index: {}]   ;;  %s1566_s1 = inlined_call_operand.vmem [shape: f32[32,128], index: 1, kind: input, shape index: {}]   ;;  %s1567_s2 = inlined_call_operand.vmem [shape: f32[32,128], index: 2, kind: input, shape index: {}]   ;;  %s1568_s3 = inlined_call_operand.vmem [shape: f32[32,128], index: 3, kind: input, shape index: {}]   ;;  %s1569_s4 = inlined_call_operand.vmem [shape: f32[32,128], index: 4, kind: input, shape index: {}]   ;;  %s1570_s5 = inlined_call_operand.vmem [shape: f32[32,128], index: 5, kind: input, shape index: {}]   ;;  %s1571_s6 = inlined_call_operand.vmem [shape: f32[32,128], index: 6, kind: input, shape index: {}]   ;;  %s1572_s7 = inlined_call_operand.vmem [shape: f32[32,128], index: 7, kind: input, shape index: {}]   ;;  %s1573_s8 = inlined_call_operand.vmem [shape: f32[32,128], index: 8, kind: input, shape index: {}]   ;;  %s1574_s9 = inlined_call_operand.vmem [shape: f32[32,128], index: 9, kind: input, shape index: {}]   ;;  %s1575_s10 = inlined_call_operand.vmem [shape: f32[2,4,128], index: 10, kind: output, shape index: {}]  }
   0x1   :  { %1577 = sst [smem:[#allocation6_spill]] %s1565_s0  ;;  %s1426_s15 = smov 0  }
   0x2   :  { %1578 = sst [smem:[#allocation7_spill]] %s1566_s1  ;;  %s1428_s16 = smov 0  }
   0x3   :  { %1579 = sst [smem:[#allocation8_spill]] %s1567_s2  ;;  %s1430_s17 = smov 0  }
   0x4   :  { %1580 = sst [smem:[#allocation9_spill]] %s1568_s3 }
   0x5   :  { %1581 = sst [smem:[#allocation10_spill]] %s1569_s4 }
   0x6 LB: > { %1582 = sst [smem:[#allocation3_spill]] %s1360_s16  ;;  %s29_s18 = sadd.s32 1, %s1356_s15  ;;  %s1364_s17 = sphi %s1430_s17, %s20_s17   ;;  %s1360_s16 = sphi %s1428_s16, %s1592_s16   ;;  %s1356_s15 = sphi %s1426_s15, %s1594_s15   ;;  %s1352_s14 = sphi %s1424_s14, %s1590_s14   ;;  %s1348_s13 = sphi %s1422_s13, %s1593_s13  }
   0x7   : > { %s32_s19 = sadd.s32 1, %s1360_s16  ;;  %p30_p0 = scmp.ge.s32.totalorder %s29_s18, 2 }
   0x8   : > { %p1201_p1 = scmp.ge.s32.totalorder %s1364_s17, 1  ;;  %p564_p2 = scmp.lt.s32.totalorder %s1364_s17, 5 }
   0x9   : > { %s1596_s18 = smov (%p30_p0, %s29_s18), 0  ;;  %s1598_s19 = smov (!%p30_p0, %s32_s19), %s1360_s16 }
   0xa   : > { %1583 = sst [smem:[#allocation4_spill]] %s1596_s18  ;;  %p565_p3 = pnand %p1201_p1, %p564_p2 }
   0xb   : > { %p34_p4 = scmp.ge.s32.totalorder %s1598_s19, 2  ;;  %s1202_s20 = sshll.u32 (!%p565_p3), %s1352_s14, 1 }
   0xc   : > { %568 = sbr.rel (%p565_p3) target bundleno = 307 (0x133), region = 60  ;;  %p796_p5 = scmp.lt.s32.totalorder (!%p565_p3), %s1352_s14, 1 }
   0xd   : > { %s1600_s19 = smov (%p34_p4, %s1598_s19), 0  ;;  %s1455_s21 = sadd.s32 (!%p565_p3), %s1348_s13, %s1202_s20 }
   0xe   : > { %1584 = sst [smem:[#allocation5_spill]] %s1600_s19  ;;  %p678_p6 = scmp.lt.s32.totalorder (!%p565_p3), %s1455_s21, 3 }
   0xf   : > { %s1585_s0 = sld [smem:[#allocation6_spill]] (!%p565_p3)  ;;  %s1586_s1 = sld [smem:[#allocation7_spill]] (!%p565_p3) }
  0x10   : > { %s1587_s2 = sld [smem:[#allocation8_spill]] (!%p565_p3)  ;;  %s1588_s3 = sld [smem:[#allocation9_spill]] (!%p565_p3) }
  0x11   : > { %s1589_s4 = sld [smem:[#allocation10_spill]] (!%p565_p3)  ;;  %p1253_p7 = scmp.ne.s32.totalorder (!%p565_p3), %s1348_s13, 0 }
  0x13   : > { %s1602_s14 = smov (!%p796_p5, %s1352_s14), 1  ;;  %v1366_v0 = vmov (!%p1253_p7), 0.0  }
  0x14   : > { %s679_s22 = scalar_select %p678_p6, %s1455_s21, 3 }
  0x15   : > { %s1252_s23 = sshll.u32 %s1602_s14, 2  ;;  %804 = vst [vmem:[#allocation2] sm:$0xff] (!%p1253_p7), %v1366_v0  ;;  %805 = vst [vmem:[#allocation2 + $0x8] sm:$0xff] (!%p1253_p7), %v1366_v0 }
  0x16   : > { %s1604_s22 = smov (!%p678_p6, %s679_s22), 3  ;;  %s1462_s26 = scalar_lea.vmem %s1575_s10, %s1252_s23  ;;  %806 = vst [vmem:[#allocation2 + $0x10] sm:$0xff] (!%p1253_p7), %v1366_v0  ;;  %807 = vst [vmem:[#allocation2 + $0x18] sm:$0xff] (!%p1253_p7), %v1366_v0 }
  0x17   : > { %s1206_s27 = sshll.u32 %s1604_s22, 3  ;;  %803 = sbr.rel (%p1253_p7) target bundleno = 30 (0x1e), region = 64 }
  0x18   : > { %s1467_s30 = scalar_lea.vmem %s1585_s0, %s1206_s27  ;;  %s1472_s20 = scalar_lea.vmem %s1586_s1, %s1206_s27 }
  0x19   : > { %s1477_s14 = scalar_lea.vmem %s1587_s2, %s1206_s27  ;;  %s1482_s23 = scalar_lea.vmem %s1588_s3, %s1206_s27 }
  0x1a   : > { %s1487_s28 = scalar_lea.vmem %s1589_s4, %s1206_s27  ;;  %s1492_s11 = scalar_lea.vmem %s1570_s5, %s1206_s27 }
  0x1b   : > { %s1497_s18 = scalar_lea.vmem %s1571_s6, %s1206_s27  ;;  %s1502_s16 = scalar_lea.vmem %s1572_s7, %s1206_s27 }
  0x1c   : > { %s1507_s22 = scalar_lea.vmem %s1573_s8, %s1206_s27  ;;  %s1512_s0 = scalar_lea.vmem %s1574_s9, %s1206_s27 }
  0x1e PF: > { %s1255_s1 = sshll.u32 %s1455_s21, 10 }
  0x1f   : > { %s1518_s2 = sadd.s32 1024, %s1255_s1 }
  0x20   : > { %p1256_p8 = scmp.gt.s32.totalorder %s1518_s2, 4000 }
  0x21   : > { %v816_v1 = vld [vmem:[%s1467_s30] sm:$0xff] (!%p1256_p8)  ;;  %v870_v32 = vld [vmem:[#allocation2 + $0x18] sm:$0xff] (!%p1256_p8)  ;;  %v829_v34 = vld [vmem:[#allocation2 + $0x8] sm:$0xff] (!%p1256_p8) }
  0x22   : > { %815 = sbr.rel (%p1256_p8) target bundleno = 61 (0x3d), region = 68  ;;  %v819_v2 = vld [vmem:[#allocation2] sm:$0xff] (!%p1256_p8)  ;;  %v817_v4 = vand.u32 (!%p1256_p8), 2147483647, %v816_v1  ;;  %v846_v41 = vld [vmem:[#allocation2 + $0x10] sm:$0xff] (!%p1256_p8) }
  0x23   : > { %v822_v3 = vld [vmem:[%s1472_s20] sm:$0xff] (!%p1256_p8) }
  0x24   : > { %v823_v5 = vand.u32 (!%p1256_p8), 2147483647, %v822_v3  ;;  %v832_v6 = vld [vmem:[%s1477_s14] sm:$0xff] (!%p1256_p8)  ;;  %v820_v10 = vadd.f32 (!%p1256_p8), %v819_v2, %v817_v4 }
  0x25   : > { %v833_v7 = vld [vmem:[%s1482_s23] sm:$0xff] (!%p1256_p8)  ;;  %v834_v8 = vmul.f32 (!%p1256_p8), %v832_v6, %v832_v6 }
  0x26   : > { %v849_v9 = vld [vmem:[%s1487_s28] sm:$0xff] (!%p1256_p8)  ;;  %v824_v11 = vmul.f32 (!%p1256_p8), -100.0, %v823_v5  ;;  %v835_v12 = vmul.f32 (!%p1256_p8), %v833_v7, %v833_v7  ;;  %821 = vst [vmem:[#allocation2] sm:$0xff] (!%p1256_p8), %v820_v10 }
  0x27   : > { %v850_v13 = vld [vmem:[%s1492_s11] sm:$0xff] (!%p1256_p8)  ;;  %v1257_v15 = vadd.f32 (!%p1256_p8), -2.0, %v849_v9 }
  0x28   : > { %v851_v14 = vld [vmem:[%s1497_s18] sm:$0xff] (!%p1256_p8)  ;;  %v855_v18 = vmul.f32 (!%p1256_p8), %v850_v13, %v850_v13  ;;  %v825_v22 = vmul.f32 (!%p1256_p8), 1.442695, %v824_v11  ;;  %v836_v23 = vadd.f32 (!%p1256_p8), %v835_v12, %v834_v8 }
  0x29   : > { %v857_v16 = vld [vmem:[%s1502_s16] sm:$0xff]  ;;  %v1258_v17 = vadd.f32 -2.0, %v851_v14 }
  0x2a   : > { %v858_v19 = vld [vmem:[%s1507_s22] sm:$0xff]  ;;  %v1259_v21 = vadd.f32 -2.0, %v857_v16  ;;  %1318 = vpow2.f32 %v825_v22  ;;  %vm839_vm0 = vcmp.eq.f32.partialorder %v836_v23, inf  ;;  %v842_v39 = vand.u32 2147483648, %v836_v23 }
  0x2b   : > { %v859_v20 = vld [vmem:[%s1512_s0] sm:$0xff]  ;;  %v854_v25 = vmul.f32 %v1258_v17, %v1257_v15  ;;  %v863_v26 = vmul.f32 %v858_v19, %v858_v19  ;;  %1320 = vrsqrt.f32 %v836_v23  ;;  %vm841_vm1 = vcmp.eq.f32.partialorder %v836_v23, 0.0 }
  0x2c   : > { %v1260_v24 = vadd.f32 -2.0, %v859_v20 }
  0x2d   : > { %v856_v27 = vsub.f32 %v854_v25, %v855_v18 }
  0x2e   : > { %v862_v28 = vmul.f32 %v1260_v24, %v1259_v21 }
  0x2f   : > { %v865_v30 = vand.u32 2147483647, %v856_v27 }
  0x30   : > { %v864_v29 = vsub.f32 %v862_v28, %v863_v26 }
  0x32   : > { %v866_v31 = vand.u32 2147483647, %v864_v29 }
  0x34   : > { %v867_v33 = vadd.f32 %v866_v31, %v865_v30  ;;  %v1319_v36 = vpop.eup %1318 }
  0x35   : > { %v1321_v37 = vpop.eup %1320  ;;  %v830_v38 = vadd.f32 %v1319_v36, %v829_v34 }
  0x36   : > { %v871_v35 = vadd.f32 %v870_v32, %v867_v33  ;;  %v838_v40 = vmul.f32 %v1321_v37, %v836_v23 }
  0x37   : > { %831 = vst [vmem:[#allocation2 + $0x8] sm:$0xff] %v830_v38 }
  0x38   : > { %872 = vst [vmem:[#allocation2 + $0x18] sm:$0xff] %v871_v35  ;;  %v840_v42 = vsel %vm839_vm0, %v836_v23, %v838_v40 }
  0x39   : > { %v843_v43 = vsel %vm841_vm1, %v842_v39, %v840_v42 }
  0x3a   : > { %v847_v44 = vadd.f32 %v846_v41, %v843_v43 }
  0x3c   : > { %848 = vst [vmem:[#allocation2 + $0x10] sm:$0xff] %v847_v44 }
  0x3d PF: > { %p1261_p9 = scmp.le.s32.totalorder %s1518_s2, 4000 }
  0x3e   : > { %v877_v45 = vlaneseq (!%p1261_p9)  ;;  %v893_v46 = vld [vmem:[%s1472_s20] sm:$0xff] (!%p1261_p9)  ;;  %v880_v50 = vstv (!%p1261_p9), %s1255_s1  ;;  %v901_v22 = vld [vmem:[#allocation2 + $0x8] sm:$0xff] (!%p1261_p9) }
  0x3f   : > { %876 = sbr.rel (%p1261_p9) target bundleno = 89 (0x59), region = 72  ;;  %v894_v47 = vand.u32 (!%p1261_p9), 2147483647, %v893_v46  ;;  %v904_v48 = vld [vmem:[%s1477_s14] sm:$0xff] (!%p1261_p9)  ;;  %v944_v21 = vld [vmem:[#allocation2 + $0x18] sm:$0xff] (!%p1261_p9) }
  0x40   : > { %v878_v49 = vshrl.u32 (!%p1261_p9), %v877_v45, 7  ;;  %v905_v51 = vld [vmem:[%s1482_s23] sm:$0xff] (!%p1261_p9)  ;;  %v906_v52 = vmul.f32 (!%p1261_p9), %v904_v48, %v904_v48  ;;  %v883_v54 = vand.u32 (!%p1261_p9), 127, %v877_v45 }
  0x41   : > { %v922_v53 = vld [vmem:[%s1487_s28] sm:$0xff] (!%p1261_p9)  ;;  %v895_v55 = vmul.f32 (!%p1261_p9), -100.0, %v894_v47  ;;  %v907_v56 = vmul.f32 (!%p1261_p9), %v905_v51, %v905_v51 }
  0x42   : > { %v923_v57 = vld [vmem:[%s1492_s11] sm:$0xff] (!%p1261_p9)  ;;  %v1262_v59 = vadd.f32 (!%p1261_p9), -2.0, %v922_v53  ;;  %v879_v61 = vmul.u32 (!%p1261_p9), 128, %v878_v49 }
  0x43   : > { %v924_v58 = vld [vmem:[%s1497_s18] sm:$0xff] (!%p1261_p9)  ;;  %v928_v0 = vmul.f32 (!%p1261_p9), %v923_v57, %v923_v57  ;;  %v896_v4 = vmul.f32 (!%p1261_p9), 1.442695, %v895_v55  ;;  %v908_v5 = vadd.f32 (!%p1261_p9), %v907_v56, %v906_v52  ;;  %v919_v32 = vld [vmem:[#allocation2 + $0x10] sm:$0xff] (!%p1261_p9) }
  0x44   : > { %v930_v60 = vld [vmem:[%s1502_s16] sm:$0xff] (!%p1261_p9)  ;;  %v1263_v63 = vadd.f32 (!%p1261_p9), -2.0, %v924_v58  ;;  %v881_v7 = vadd.s32 (!%p1261_p9), %v880_v50, %v879_v61 }
  0x45   : > { %v886_v62 = vld [vmem:[%s1467_s30] sm:$0xff] (!%p1261_p9)  ;;  %v1264_v3 = vadd.f32 (!%p1261_p9), -2.0, %v930_v60  ;;  %1322 = vpow2.f32 (!%p1261_p9), %v896_v4  ;;  %vm911_vm3 = vcmp.eq.f32.partialorder (!%p1261_p9), %v908_v5, inf  ;;  %v914_v28 = vand.u32 (!%p1261_p9), 2147483648, %v908_v5 }
  0x46   : > { %v931_v1 = vld [vmem:[%s1507_s22] sm:$0xff]  ;;  %v927_v8 = vmul.f32 %v1263_v63, %v1262_v59  ;;  %v887_v10 = vand.u32 2147483647, %v886_v62  ;;  %v884_v11 = vadd.s32 %v883_v54, %v881_v7  ;;  %1324 = vrsqrt.f32 %v908_v5 }
  0x47   : > { %v932_v2 = vld [vmem:[%s1512_s0] sm:$0xff]  ;;  %v936_v9 = vmul.f32 %v931_v1, %v931_v1  ;;  %vm913_vm4 = vcmp.eq.f32.partialorder %v908_v5, 0.0 }
  0x48   : > { %v1265_v6 = vadd.f32 -2.0, %v932_v2  ;;  %v929_v12 = vsub.f32 %v927_v8, %v928_v0  ;;  %v890_v14 = vld [vmem:[#allocation2] sm:$0xff]  ;;  %vm885_vm2 = vcmp.lt.s32.totalorder %v884_v11, 4000 }
  0x49   : > { %v888_v17 = vsel %vm885_vm2, %v887_v10, 0.0 }
  0x4a   : > { %v935_v13 = vmul.f32 %v1265_v6, %v1264_v3  ;;  %v938_v16 = vand.u32 2147483647, %v929_v12  ;;  %v891_v18 = vadd.f32 %v890_v14, %v888_v17 }
  0x4c   : > { %v937_v15 = vsub.f32 %v935_v13, %v936_v9  ;;  %892 = vst [vmem:[#allocation2] sm:$0xff] %v891_v18 }
  0x4e   : > { %v939_v19 = vand.u32 2147483647, %v937_v15 }
  0x4f   : > { %v1323_v24 = vpop.eup %1322 }
  0x50   : > { %v940_v20 = vadd.f32 %v939_v19, %v938_v16  ;;  %v1325_v26 = vpop.eup %1324  ;;  %v898_v27 = vsel %vm885_vm2, %v1323_v24, 0.0 }
  0x51   : > { %v902_v29 = vadd.f32 %v901_v22, %v898_v27  ;;  %v910_v30 = vmul.f32 %v1325_v26, %v908_v5 }
  0x52   : > { %v941_v23 = vsel %vm885_vm2, %v940_v20, 0.0 }
  0x53   : > { %v945_v25 = vadd.f32 %v944_v21, %v941_v23  ;;  %903 = vst [vmem:[#allocation2 + $0x8] sm:$0xff] %v902_v29  ;;  %v912_v31 = vsel %vm911_vm3, %v908_v5, %v910_v30 }
  0x54   : > { %v915_v33 = vsel %vm913_vm4, %v914_v28, %v912_v31 }
  0x55   : > { %946 = vst [vmem:[#allocation2 + $0x18] sm:$0xff] %v945_v25  ;;  %v916_v34 = vsel %vm885_vm2, %v915_v33, 0.0 }
  0x56   : > { %v920_v35 = vadd.f32 %v919_v32, %v916_v34 }
  0x58   : > { %921 = vst [vmem:[#allocation2 + $0x10] sm:$0xff] %v920_v35 }
  0x59 PF: > { %p1266_p10 = scmp.ne.s32.totalorder %s1348_s13, 1 }
  0x5a   : > { %v951_v37 = vld [vmem:[#allocation2] sm:$0xff] (!%p1266_p10)  ;;  %v963_v39 = vld [vmem:[#allocation2 + $0x8] sm:$0xff] (!%p1266_p10)  ;;  %vm998_vm5 = vcmask (!%p1266_p10), 1040384   ;;  %vm1000_vm6 = vcmask (!%p1266_p10), 1041408   ;;  %vm1002_vm7 = vcmask (!%p1266_p10), 1042432  }
  0x5b   : > { %950 = sbr.rel (%p1266_p10) target bundleno = 307 (0x133), region = 76  ;;  %952 = vadd.xlane.f32.xlu0 (!%p1266_p10), %v951_v37 }
  0x5c   : > { %v987_v38 = vld [vmem:[#allocation2 + $0x18] sm:$0xff] (!%p1266_p10) }
  0x5f   : > { %v975_v36 = vld [vmem:[#allocation2 + $0x10] sm:$0xff] (!%p1266_p10)  ;;  %964 = vadd.xlane.f32.xlu0 (!%p1266_p10), %v963_v39 }
  0x60   : > { %976 = vadd.xlane.f32.xlu1 (!%p1266_p10), %v975_v36 }
  0x64   : > { %988 = vadd.xlane.f32.xlu1 %v987_v38 }
  0xe8   : > { %v953_v41 = vpop.xlane.xlu0 %952 }
  0xe9   : > { %v954_v43 = vrot.slane %v953_v41, 4 }
  0xeb   : > { %v955_v45 = vadd.f32 %v954_v43, %v953_v41 }
  0xec   : > { %v965_v47 = vpop.xlane.xlu0 %964 }
  0xed   : > { %v977_v40 = vpop.xlane.xlu1 %976  ;;  %v956_v49 = vrot.slane %v955_v45, 2  ;;  %v966_v51 = vrot.slane %v965_v47, 4 }
  0xee   : > { %v978_v42 = vrot.slane %v977_v40, 4 }
  0xef   : > { %v967_v53 = vadd.f32 %v966_v51, %v965_v47  ;;  %v957_v54 = vadd.f32 %v956_v49, %v955_v45 }
  0xf0   : > { %v979_v44 = vadd.f32 %v978_v42, %v977_v40 }
  0xf1   : > { %v989_v46 = vpop.xlane.xlu1 %988  ;;  %v968_v57 = vrot.slane %v967_v53, 2  ;;  %v958_v58 = vrot.slane %v957_v54, 1 }
  0xf2   : > { %v980_v48 = vrot.slane %v979_v44, 2  ;;  %v990_v50 = vrot.slane %v989_v46, 4 }
  0xf3   : > { %v969_v60 = vadd.f32 %v968_v57, %v967_v53  ;;  %v959_v61 = vadd.f32 %v958_v58, %v957_v54 }
  0xf4   : > { %v991_v52 = vadd.f32 %v990_v50, %v989_v46  ;;  %v981_v55 = vadd.f32 %v980_v48, %v979_v44 }
  0xf5   : > { %1269 = vpush %v959_v61  ;;  %v970_v63 = vrot.slane %v969_v60, 1 }
  0xf6   : > { %v992_v56 = vrot.slane %v991_v52, 2  ;;  %v982_v62 = vrot.slane %v981_v55, 1 }
  0xf7   : > { %v971_v1 = vadd.f32 %v970_v63, %v969_v60 }
  0xf8   : > { %v993_v59 = vadd.f32 %v992_v56, %v991_v52  ;;  %v983_v3 = vadd.f32 %v982_v62, %v981_v55 }
  0xf9   : > { %1271 = vpush %v971_v1 }
  0xfa   : > { %v994_v0 = vrot.slane %v993_v59, 1  ;;  %1273 = vpush %v983_v3 }
  0xfc   : > { %v995_v2 = vadd.f32 %v994_v0, %v993_v59 }
  0xfe   : > { %1275 = vpush %v995_v2 }
 0x126   : > { %s1270_s3 = spop %1269 }
 0x127   : > { %v961_v4 = vstv %s1270_s3 }
 0x12a   : > { %s1272_s4 = spop %1271 }
 0x12b   : > { %v973_v5 = vstv %s1272_s4  ;;  %s1274_s13 = spop %1273 }
 0x12c   : > { %v999_v6 = vsel %vm998_vm5, %v961_v4, %v973_v5  ;;  %v985_v7 = vstv %s1274_s13 }
 0x12d   : > { %v1001_v8 = vsel %vm1000_vm6, %v999_v6, %v985_v7 }
 0x12f   : > { %s1276_s21 = spop %1275 }
 0x130   : > { %v997_v9 = vstv %s1276_s21 }
 0x131   : > { %v1003_v10 = vsel %vm1002_vm7, %v1001_v8, %v997_v9 }
 0x132   : > { %1004 = vst [vmem:[%s1462_s26] sm:$0xf] %v1003_v10 }
 0x133 PF: > { %s20_s17 = sadd.s32 1, %s1364_s17   ;;  %s1590_s14 = sld [smem:[#allocation3_spill]] }
 0x134   : > { %p17_p11 = scmp.ge.s32.totalorder %s20_s17, 6   ;;  %s1591_s27 = sld [smem:[#allocation4_spill]] }
 0x135   : > { %s1592_s16 = sld [smem:[#allocation5_spill]]  ;;  %s1593_s13 = smov %s1356_s15 }
 0x136   :  { %19 = sbr.rel (!%p17_p11) target bundleno = 6 (0x6), region = 142 }
 0x13a   : > { %s1594_s15 = smov %s1591_s27 }

</bundles_post_ra>
